<compile_context>
chip_gen: v7x
topology: tpu7x:2x2x1
jax: 0.10.0
libtpu: 0.0.40
codegen_flags: <defaults>
</compile_context>

<pallas_src>
import functools

import jax
import jax.numpy as jnp
from jax.experimental import pallas as pl
from jax.experimental.pallas import tpu as pltpu

K_IN = 28 * 28      # 784; streamed at full width (divisible by 8, == full dim)
H1 = 256
H2 = 128
N_OUT = 10
N_PAD = 128         # lane-dense output width (unmasked stores); sliced to 10 outside


def _cdiv(a, b):
    return -(-a // b)


def _round_up(x, m):
    return _cdiv(x, m) * m


def fcnn_kernel(x_ref, w1_ref, b1_ref, w2_ref, b2_ref, w3_ref, b3_ref, o_ref):
    """Fused 3-layer MLP for one batch tile.

    x_ref: (TB, 784) f32 or bf16; wN_ref: bf16 (in, out); bN_ref: (1, out) f32;
    o_ref: (TB, 128) bf16.  bf16 operands, f32 accumulation, fused ReLUs.
    """
    x = x_ref[...].astype(jnp.bfloat16)

    h1 = jnp.dot(x, w1_ref[...], preferred_element_type=jnp.float32) + b1_ref[...]
    h1 = jnp.maximum(h1, 0.0).astype(jnp.bfloat16)            # ReLU

    h2 = jnp.dot(h1, w2_ref[...], preferred_element_type=jnp.float32) + b2_ref[...]
    h2 = jnp.maximum(h2, 0.0).astype(jnp.bfloat16)            # ReLU

    out = jnp.dot(h2, w3_ref[...], preferred_element_type=jnp.float32) + b3_ref[...]
    o_ref[...] = out.astype(o_ref.dtype)


def _choose_batch_tiling(B, tb):
    """Pick (TB, Bp, n_tiles): minimal zero-pad; prefer >= 2 tiles when there
    are enough rows so the 'parallel' batch axis can shard across v7x's 2 TCs."""
    n_tiles = max(_cdiv(B, tb), 1)
    if n_tiles == 1 and B >= 16:
        n_tiles = 2
    TB = _round_up(_cdiv(B, n_tiles), 8)
    n_tiles = _cdiv(B, TB)
    return TB, TB * n_tiles, n_tiles


@functools.partial(jax.jit, static_argnames=("tb",))
def fcnn_forward(x_nchw, params, *, tb=512):
    """x_nchw: (B, 1, 28, 28) float32 (or bfloat16) -> logits (B, 10) bfloat16."""
    w1, b1, w2, b2, w3, b3 = params
    B = x_nchw.shape[0]

    # nn.Flatten(): metadata-only reshape. No K-pad and no dtype cast here — a
    # standalone pad/cast pass would re-read and re-write all of x in HBM.
    x_flat = x_nchw.reshape(B, K_IN)

    TB, Bp, n_tiles = _choose_batch_tiling(B, tb)
    if Bp != B:
        x_flat = jnp.pad(x_flat, ((0, Bp - B), (0, 0)))  # padded rows sliced off below

    out_padded = pl.pallas_call(
        fcnn_kernel,
        out_shape=jax.ShapeDtypeStruct((Bp, N_PAD), jnp.bfloat16),
        grid_spec=pltpu.PrefetchScalarGridSpec(
            num_scalar_prefetch=0,
            grid=(n_tiles,),
            in_specs=[
                # streaming batch tiles of x; last dim 784 == full array dim
                pl.BlockSpec((TB, K_IN), lambda i: (i, 0)),
                # VMEM-resident weights / biases (same block every grid step).
                # TODO(synk): on v7x (64 MiB VMEM), pipeline_mode=pl.Buffered(1)
                # on these constant-index specs would free ~0.6 MiB of headroom.
                pl.BlockSpec((K_IN, H1), lambda i: (0, 0)),
                pl.BlockSpec((1, H1), lambda i: (0, 0)),
                pl.BlockSpec((H1, H2), lambda i: (0, 0)),
                pl.BlockSpec((1, H2), lambda i: (0, 0)),
                pl.BlockSpec((H2, N_PAD), lambda i: (0, 0)),
                pl.BlockSpec((1, N_PAD), lambda i: (0, 0)),
            ],
            out_specs=pl.BlockSpec((TB, N_PAD), lambda i: (i, 0)),
        ),
        compiler_params=pltpu.CompilerParams(
            dimension_semantics=("parallel",),   # batch tiles shard across TCs (v7x)
        ),
    )(x_flat, w1, b1, w2, b2, w3, b3)

    return out_padded[:B, :N_OUT]


def init_params(key):
    """Deterministic init matching nn.Linear shapes.

    Weights are stored transposed vs. PyTorch ((in, out)) in bfloat16:
    W1 (784, 256), W2 (256, 128), W3 zero-padded (128, 10) -> (128, 128) so the
    final matmul writes a lane-dense 128-wide tile.  Biases stay float32,
    b3 zero-padded to (1, 128).  Padded columns contribute exactly zero.
    """
    dims = [(K_IN, H1), (H1, H2), (H2, N_OUT)]
    pad_out = [H1, H2, N_PAD]
    params = []
    for (fan_in, fan_out), pout in zip(dims, pad_out):
        kw, kb, key = jax.random.split(key, 3)
        bound = float(fan_in) ** -0.5  # same scale as PyTorch default init
        w = jax.random.uniform(kw, (fan_in, fan_out), jnp.float32, -bound, bound)
        b = jax.random.uniform(kb, (1, fan_out), jnp.float32, -bound, bound)
        w = jnp.pad(w, ((0, 0), (0, pout - fan_out))).astype(jnp.bfloat16)
        b = jnp.pad(b, ((0, 0), (0, pout - fan_out))).astype(jnp.float32)
        params.extend([w, b])
    return tuple(params)


if __name__ == "__main__":
    key = jax.random.PRNGKey(0)
    k_x, k_p = jax.random.split(key)

    B = 8
    x = jax.random.normal(k_x, (B, 1, 28, 28), dtype=jnp.float32)  # NCHW like PyTorch
    params = init_params(k_p)

    logits = fcnn_forward(x, params)
    jax.block_until_ready(logits)

    # Pure-JAX reference with identical numerics (bf16 operands, f32 accum).
    # Note: not bit-identical to a pure-f32 PyTorch FCNN (bf16 weights/activations).
    w1, b1, w2, b2, w3, b3 = params
    xf = x.reshape(B, K_IN).astype(jnp.bfloat16)
    ref = jnp.maximum(jnp.dot(xf, w1, preferred_element_type=jnp.float32) + b1, 0.0)
    ref = ref.astype(jnp.bfloat16)
    ref = jnp.maximum(jnp.dot(ref, w2, preferred_element_type=jnp.float32) + b2, 0.0)
    ref = ref.astype(jnp.bfloat16)
    ref = jnp.dot(ref, w3, preferred_element_type=jnp.float32) + b3
    ref = ref[:, :N_OUT].astype(jnp.bfloat16)

    assert logits.shape == (B, N_OUT)
    lf = logits.astype(jnp.float32)
    rf = ref.astype(jnp.float32)
    assert jnp.allclose(lf, rf, atol=2e-2, rtol=2e-2), float(jnp.max(jnp.abs(lf - rf)))

    print("KERNEL_OK")
</pallas_src>

<mosaic_0001>
module attributes {stable_mosaic.version = 11 : i64} {
  func.func @fcnn_kernel(%arg0: i32, %arg1: memref<8x784xf32, #tpu.memory_space<vmem>>, %arg2: memref<784x256xbf16, #tpu.memory_space<vmem>>, %arg3: memref<1x256xf32, #tpu.memory_space<vmem>>, %arg4: memref<256x128xbf16, #tpu.memory_space<vmem>>, %arg5: memref<1x128xf32, #tpu.memory_space<vmem>>, %arg6: memref<128x128xbf16, #tpu.memory_space<vmem>>, %arg7: memref<1x128xf32, #tpu.memory_space<vmem>>, %arg8: memref<8x128xbf16, #tpu.memory_space<vmem>>) attributes {dimension_semantics = [#tpu.dimension_semantics<parallel>], iteration_bounds = array<i64: 1>, scalar_prefetch = 0 : i64, scratch_operands = 0 : i64, tpu.core_type = #tpu.core_type<tc>, window_params = [{transform_indices = @transform_0, window_bounds = array<i64: 8, 784>}, {pipeline_mode = #tpu.pipeline_mode<synchronous>, transform_indices = @transform_1, window_bounds = array<i64: 784, 256>}, {pipeline_mode = #tpu.pipeline_mode<synchronous>, transform_indices = @transform_2, window_bounds = array<i64: 1, 256>}, {pipeline_mode = #tpu.pipeline_mode<synchronous>, transform_indices = @transform_3, window_bounds = array<i64: 256, 128>}, {pipeline_mode = #tpu.pipeline_mode<synchronous>, transform_indices = @transform_4, window_bounds = array<i64: 1, 128>}, {pipeline_mode = #tpu.pipeline_mode<synchronous>, transform_indices = @transform_5, window_bounds = array<i64: 128, 128>}, {pipeline_mode = #tpu.pipeline_mode<synchronous>, transform_indices = @transform_6, window_bounds = array<i64: 1, 128>}, {transform_indices = @transform_7, window_bounds = array<i64: 8, 128>}]} {
    %c0 = arith.constant 0 : index
    %c0_0 = arith.constant 0 : index
    %0 = vector.load %arg1[%c0, %c0_0] : memref<8x784xf32, #tpu.memory_space<vmem>>, vector<8x784xf32>
    %1 = arith.truncf %0 : vector<8x784xf32> to vector<8x784xbf16>
    %c0_1 = arith.constant 0 : index
    %c0_2 = arith.constant 0 : index
    %2 = vector.load %arg2[%c0_1, %c0_2] : memref<784x256xbf16, #tpu.memory_space<vmem>>, vector<784x256xbf16>
    %cst = arith.constant dense<0.000000e+00> : vector<8x256xf32>
    %3 = tpu.matmul %1, %2, %cst {dimension_numbers = #tpu.dot_dimension_numbers<[1], [0], [0], [1], [0, 0, 1, 1], [], []>} : vector<8x784xbf16>, vector<784x256xbf16>, vector<8x256xf32> -> vector<8x256xf32>
    %c0_3 = arith.constant 0 : index
    %c0_4 = arith.constant 0 : index
    %4 = vector.load %arg3[%c0_3, %c0_4] : memref<1x256xf32, #tpu.memory_space<vmem>>, vector<1x256xf32>
    %5 = vector.broadcast %4 : vector<1x256xf32> to vector<8x256xf32>
    %6 = arith.addf %3, %5 : vector<8x256xf32>
    %cst_5 = arith.constant 0.000000e+00 : f32
    %7 = vector.broadcast %cst_5 : f32 to vector<8x256xf32>
    %8 = arith.maximumf %6, %7 : vector<8x256xf32>
    %9 = arith.truncf %8 : vector<8x256xf32> to vector<8x256xbf16>
    %c0_6 = arith.constant 0 : index
    %c0_7 = arith.constant 0 : index
    %10 = vector.load %arg4[%c0_6, %c0_7] : memref<256x128xbf16, #tpu.memory_space<vmem>>, vector<256x128xbf16>
    %cst_8 = arith.constant dense<0.000000e+00> : vector<8x128xf32>
    %11 = tpu.matmul %9, %10, %cst_8 {dimension_numbers = #tpu.dot_dimension_numbers<[1], [0], [0], [1], [0, 0, 1, 1], [], []>} : vector<8x256xbf16>, vector<256x128xbf16>, vector<8x128xf32> -> vector<8x128xf32>
    %c0_9 = arith.constant 0 : index
    %c0_10 = arith.constant 0 : index
    %12 = vector.load %arg5[%c0_9, %c0_10] : memref<1x128xf32, #tpu.memory_space<vmem>>, vector<1x128xf32>
    %13 = vector.broadcast %12 : vector<1x128xf32> to vector<8x128xf32>
    %14 = arith.addf %11, %13 : vector<8x128xf32>
    %cst_11 = arith.constant 0.000000e+00 : f32
    %15 = vector.broadcast %cst_11 : f32 to vector<8x128xf32>
    %16 = arith.maximumf %14, %15 : vector<8x128xf32>
    %17 = arith.truncf %16 : vector<8x128xf32> to vector<8x128xbf16>
    %c0_12 = arith.constant 0 : index
    %c0_13 = arith.constant 0 : index
    %18 = vector.load %arg6[%c0_12, %c0_13] : memref<128x128xbf16, #tpu.memory_space<vmem>>, vector<128x128xbf16>
    %cst_14 = arith.constant dense<0.000000e+00> : vector<8x128xf32>
    %19 = tpu.matmul %17, %18, %cst_14 {dimension_numbers = #tpu.dot_dimension_numbers<[1], [0], [0], [1], [0, 0, 1, 1], [], []>} : vector<8x128xbf16>, vector<128x128xbf16>, vector<8x128xf32> -> vector<8x128xf32>
    %c0_15 = arith.constant 0 : index
    %c0_16 = arith.constant 0 : index
    %20 = vector.load %arg7[%c0_15, %c0_16] : memref<1x128xf32, #tpu.memory_space<vmem>>, vector<1x128xf32>
    %21 = vector.broadcast %20 : vector<1x128xf32> to vector<8x128xf32>
    %22 = arith.addf %19, %21 : vector<8x128xf32>
    %23 = arith.truncf %22 : vector<8x128xf32> to vector<8x128xbf16>
    %c0_17 = arith.constant 0 : index
    %c0_18 = arith.constant 0 : index
    %24 = vector.load %arg8[%c0_17, %c0_18] : memref<8x128xbf16, #tpu.memory_space<vmem>>, vector<8x128xbf16>
    tpu.vector_store %arg8[%c0_17, %c0_18], %23 {strides = array<i32>} : memref<8x128xbf16, #tpu.memory_space<vmem>>, vector<8x128xbf16>,
    return
  }
  func.func @transform_0(%arg0: i32) -> (i32, i32) {
    %c0_i32 = arith.constant 0 : i32
    %c0_i32_0 = arith.constant 0 : i32
    return %arg0, %c0_i32 : i32, i32
  }
  func.func @transform_1(%arg0: i32) -> (i32, i32) {
    %c0_i32 = arith.constant 0 : i32
    %c0_i32_0 = arith.constant 0 : i32
    %c0_i32_1 = arith.constant 0 : i32
    return %c0_i32, %c0_i32_0 : i32, i32
  }
  func.func @transform_2(%arg0: i32) -> (i32, i32) {
    %c0_i32 = arith.constant 0 : i32
    %c0_i32_0 = arith.constant 0 : i32
    %c0_i32_1 = arith.constant 0 : i32
    return %c0_i32, %c0_i32_0 : i32, i32
  }
  func.func @transform_3(%arg0: i32) -> (i32, i32) {
    %c0_i32 = arith.constant 0 : i32
    %c0_i32_0 = arith.constant 0 : i32
    %c0_i32_1 = arith.constant 0 : i32
    return %c0_i32, %c0_i32_0 : i32, i32
  }
  func.func @transform_4(%arg0: i32) -> (i32, i32) {
    %c0_i32 = arith.constant 0 : i32
    %c0_i32_0 = arith.constant 0 : i32
    %c0_i32_1 = arith.constant 0 : i32
    return %c0_i32, %c0_i32_0 : i32, i32
  }
  func.func @transform_5(%arg0: i32) -> (i32, i32) {
    %c0_i32 = arith.constant 0 : i32
    %c0_i32_0 = arith.constant 0 : i32
    %c0_i32_1 = arith.constant 0 : i32
    return %c0_i32, %c0_i32_0 : i32, i32
  }
  func.func @transform_6(%arg0: i32) -> (i32, i32) {
    %c0_i32 = arith.constant 0 : i32
    %c0_i32_0 = arith.constant 0 : i32
    %c0_i32_1 = arith.constant 0 : i32
    return %c0_i32, %c0_i32_0 : i32, i32
  }
  func.func @transform_7(%arg0: i32) -> (i32, i32) {
    %c0_i32 = arith.constant 0 : i32
    %c0_i32_0 = arith.constant 0 : i32
    return %arg0, %c0_i32 : i32, i32
  }
}

</mosaic_0001>

<bundles_post_ra>
// kernel: fcnn_forward.1
= control target key start
LH: loop header
LB: loop body
LE: loop exit
PB: predicated region body
PF: predicated region fallthrough
CT: control target
= control target key end

     0   :  { %12 = vsyncpa [#allocation3], 0  ;;  %s1995_s0 = inlined_call_operand.vmem [shape: f32[8,784], index: 0, kind: input, shape index: {}]   ;;  %s1996_s1 = inlined_call_operand.vmem [shape: bf16[784,256], index: 1, kind: input, shape index: {}]   ;;  %s1997_s2 = inlined_call_operand.vmem [shape: f32[1,256], index: 2, kind: input, shape index: {}]   ;;  %s1998_s3 = inlined_call_operand.hbm [shape: bf16[256,128], index: 3, kind: input, shape index: {}]   ;;  %s1999_s4 = inlined_call_operand.vmem [shape: f32[1,128], index: 4, kind: input, shape index: {}]   ;;  %s2000_s5 = inlined_call_operand.hbm [shape: bf16[128,128], index: 5, kind: input, shape index: {}]   ;;  %s2001_s6 = inlined_call_operand.vmem [shape: f32[1,128], index: 6, kind: input, shape index: {}]   ;;  %s2002_s7 = inlined_call_operand.hbm [shape: bf16[8,128], index: 7, kind: output, shape index: {}]  }
   0x1   :  { %13 = vsyncpa [#allocation6], 0 }
   0x2   :  { %14 = vsyncpa [#allocation4], 0  ;;  %s1587_s24 = smov [#allocation2]   ;;  %s1515_s28 = scalar_lea.hbm %s1998_s3, 2048 }
   0x3   :  { %s26_s25 = sshll.u32 %s1587_s24, 4  ;;  %p1516_p0 = scmp.ne.s32.totalorder %s1998_s3, %s1515_s28  ;;  %s27_s25 = int_to_ptr.vmem [resolvable:$true] %s26_s25 }
   0x4   :  { %p1519_p1 = scmp.lt.u32.totalorder %s1515_s28, %s1998_s3 }
   0x6   :  { %p1521_p2 = pnand %p1519_p1, %p1516_p0 }
   0x8   :  { %1524 = shalt.err (!%p1521_p2)
}
   0x9   :  { %s1525_s10 = scalar_lea.vmem %s27_s25, 2048  ;;  %p1530_p4 = scmp.lt.s32.totalorder %s27_s25, %s27_s25 }
   0xa   :  { %p1526_p3 = scmp.ne.s32.totalorder %s27_s25, %s1525_s10  ;;  %p1531_p5 = scmp.lt.s32.totalorder %s1525_s10, %s1525_s10 }
   0xc   :  { %p1532_p6 = por %p1531_p5, %p1530_p4 }
   0xe   :  { %p1533_p7 = pnand %p1532_p6, %p1526_p3 }
  0x10   :  { %1536 = shalt.err (!%p1533_p7)
}
  0x11   :  { %s1588_s11 = smov 64   ;;  %s1589_s12 = smov 4  }
  0x12   :  { %32 = dma.hbm_to_vmem [thread:$0]  %s1998_s3, 2048, %s27_s25, [#allocation3], %s1588_s11, %s1588_s11, %s1589_s12  }
  0x13   :  { %s1590_s15 = smov [#allocation5]   ;;  %s1537_s19 = scalar_lea.hbm %s2000_s5, 1024 }
  0x14   :  { %s40_s16 = sshll.u32 %s1590_s15, 4  ;;  %p1538_p8 = scmp.ne.s32.totalorder %s2000_s5, %s1537_s19  ;;  %s41_s16 = int_to_ptr.vmem [resolvable:$true] %s40_s16 }
  0x15   :  { %p1541_p9 = scmp.lt.u32.totalorder %s1537_s19, %s2000_s5 }
  0x17   :  { %p1543_p10 = pnand %p1541_p9, %p1538_p8 }
  0x19   :  { %1546 = shalt.err (!%p1543_p10)
}
  0x1a   :  { %s1547_s24 = scalar_lea.vmem %s41_s16, 1024  ;;  %p1552_p12 = scmp.lt.s32.totalorder %s41_s16, %s41_s16 }
  0x1b   :  { %p1548_p11 = scmp.ne.s32.totalorder %s41_s16, %s1547_s24  ;;  %p1553_p13 = scmp.lt.s32.totalorder %s1547_s24, %s1547_s24 }
  0x1d   :  { %p1554_p0 = por %p1553_p13, %p1552_p12 }
  0x1f   :  { %p1555_p1 = pnand %p1554_p0, %p1548_p11 }
  0x21   :  { %1558 = shalt.err (!%p1555_p1)
}
  0x22   :  { %46 = dma.hbm_to_vmem [thread:$0]  %s2000_s5, 1024, %s41_s16, [#allocation6], %s1588_s11, %s1588_s11, %s1589_s12  }
  0x23   :  { %1581 = dma.done.wait [#allocation3], 2048  }
  0x24   :  { %1582 = vsyncadd [#allocation3], 4294965248 }
  0x25   :  { %1583 = dma.done.wait [#allocation6], 1024  }
  0x26   :  { %1584 = vsyncadd [#allocation6], 4294966272  ;;  %v1344_v0 = vld [vmem:[%s1996_s1 + $0x104] ss:$8 sps:$4 sm:$0xff]   ;;  %v1346_v1 = vld [vmem:[%s1996_s1 + $0x100] ss:$8 sps:$4 sm:$0xff]  }
  0x27   :  { %715 = vmatprep.subr.bf16.mxu0 %v1344_v0  ;;  %v1347_v2 = vld [vmem:[%s1996_s1 + $0x114] ss:$8 sps:$4 sm:$0xff]   ;;  %v1349_v3 = vld [vmem:[%s1996_s1 + $0x110] ss:$8 sps:$4 sm:$0xff]   ;;  %v1350_v4 = vld [vmem:[%s1996_s1 + $0x124] ss:$8 sps:$4 sm:$0xff]  }
  0x28   :  { %716 = vmatpush1.bf16.msra.mxu0 %v1346_v1  ;;  %v1352_v5 = vld [vmem:[%s1996_s1 + $0x120] ss:$8 sps:$4 sm:$0xff]   ;;  %v1353_v6 = vld [vmem:[%s1996_s1 + $0x134] ss:$8 sps:$4 sm:$0xff]   ;;  %v1355_v7 = vld [vmem:[%s1996_s1 + $0x130] ss:$8 sps:$4 sm:$0xff]  }
  0x29   :  { %717 = vmatprep.subr.bf16.mxu0 %v1347_v2  ;;  %v1356_v8 = vld [vmem:[%s1996_s1 + $0x144] ss:$8 sps:$4 sm:$0xff]   ;;  %v1358_v9 = vld [vmem:[%s1996_s1 + $0x140] ss:$8 sps:$4 sm:$0xff]   ;;  %v1359_v10 = vld [vmem:[%s1996_s1 + $0x154] ss:$8 sps:$4 sm:$0xff]  }
  0x2a   :  { %v1361_v11 = vld [vmem:[%s1996_s1 + $0x150] ss:$8 sps:$4 sm:$0xff]   ;;  %v1362_v12 = vld [vmem:[%s1996_s1 + $0x164] ss:$8 sps:$4 sm:$0xff]   ;;  %v1364_v15 = vld [vmem:[%s1996_s1 + $0x160] ss:$8 sps:$4 sm:$0xff]  }
  0x2b   :  { %v59_v13 = vld [vmem:[%s1995_s0 + $0x18] sm:$0xff]  ;;  %v1398_v17 = vld [vmem:[%s1996_s1 + $0x4] ss:$8 sps:$4 sm:$0xff]   ;;  %v1403_v20 = vld [vmem:[%s1996_s1] ss:$8 sps:$4 sm:$0xff]   ;;  %vm670_vm0 = vcmask 130048  }
  0x2c   :  { %718 = vmatpush1.bf16.msra.mxu0 %v1349_v3  ;;  %v66_v14 = vpack.c.bf16 %v59_v13, %v59_v13  ;;  %v1365_v16 = vld [vmem:[%s1996_s1 + $0x174] ss:$8 sps:$4 sm:$0xff]   ;;  %v1367_v18 = vld [vmem:[%s1996_s1 + $0x170] ss:$8 sps:$4 sm:$0xff]   ;;  %v1368_v19 = vld [vmem:[%s1996_s1 + $0x184] ss:$8 sps:$4 sm:$0xff]   ;;  %674 = vmatprep.subr.bf16.mxu1 %v1398_v17 }
  0x2d   :  { %719 = vmatprep.subr.bf16.mxu0 %v1350_v4  ;;  %v1404_v21 = vld [vmem:[%s1996_s1 + $0x14] ss:$8 sps:$4 sm:$0xff]   ;;  %675 = vmatpush1.bf16.msra.mxu1 %v1403_v20  ;;  %v1409_v22 = vld [vmem:[%s1996_s1 + $0x10] ss:$8 sps:$4 sm:$0xff]   ;;  %v1410_v23 = vld [vmem:[%s1996_s1 + $0x24] ss:$8 sps:$4 sm:$0xff]  }
  0x2e   :  { %747 = vmatprep.mubr.bf16.mxu0 %v66_v14  ;;  %676 = vmatprep.subr.bf16.mxu1 %v1404_v21  ;;  %v1370_v24 = vld [vmem:[%s1996_s1 + $0x180] ss:$8 sps:$4 sm:$0xff]   ;;  %v1371_v25 = vld [vmem:[%s1996_s1 + $0x194] ss:$8 sps:$4 sm:$0xff]   ;;  %v1373_v28 = vld [vmem:[%s1996_s1 + $0x190] ss:$8 sps:$4 sm:$0xff]  }
  0x2f   :  { %v1415_v26 = vld [vmem:[%s1996_s1 + $0x20] ss:$8 sps:$4 sm:$0xff]   ;;  %v1416_v27 = vld [vmem:[%s1996_s1 + $0x34] ss:$8 sps:$4 sm:$0xff]   ;;  %v1374_v29 = vld [vmem:[%s1996_s1 + $0x1a4] ss:$8 sps:$4 sm:$0xff]  }
  0x30   :  { %720 = vmatpush1.bf16.msra.mxu0 %v1352_v5  ;;  %v1421_v30 = vld [vmem:[%s1996_s1 + $0x30] ss:$8 sps:$4 sm:$0xff]   ;;  %v1422_v31 = vld [vmem:[%s1996_s1 + $0x44] ss:$8 sps:$4 sm:$0xff]   ;;  %v1376_v32 = vld [vmem:[%s1996_s1 + $0x1a0] ss:$8 sps:$4 sm:$0xff]  }
  0x31   :  { %721 = vmatprep.subr.bf16.mxu0 %v1353_v6  ;;  %677 = vmatpush1.bf16.msra.mxu1 %v1409_v22  ;;  %v1377_v33 = vld [vmem:[%s1996_s1 + $0x1b4] ss:$8 sps:$4 sm:$0xff]   ;;  %v1427_v34 = vld [vmem:[%s1996_s1 + $0x40] ss:$8 sps:$4 sm:$0xff]   ;;  %v1379_v36 = vld [vmem:[%s1996_s1 + $0x1b0] ss:$8 sps:$4 sm:$0xff]  }
  0x32   :  { %678 = vmatprep.subr.bf16.mxu1 %v1410_v23  ;;  %v1428_v35 = vld [vmem:[%s1996_s1 + $0x54] ss:$8 sps:$4 sm:$0xff]   ;;  %v1380_v37 = vld [vmem:[%s1996_s1 + $0x1c4] ss:$8 sps:$4 sm:$0xff]   ;;  %v1433_v38 = vld [vmem:[%s1996_s1 + $0x50] ss:$8 sps:$4 sm:$0xff]  }
  0x33   :  { %v1434_v39 = vld [vmem:[%s1996_s1 + $0x64] ss:$8 sps:$4 sm:$0xff]   ;;  %v1382_v40 = vld [vmem:[%s1996_s1 + $0x1c0] ss:$8 sps:$4 sm:$0xff]   ;;  %v1383_v41 = vld [vmem:[%s1996_s1 + $0x1d4] ss:$8 sps:$4 sm:$0xff]  }
  0x34   :  { %722 = vmatpush1.bf16.msra.mxu0 %v1355_v7  ;;  %v1439_v42 = vld [vmem:[%s1996_s1 + $0x60] ss:$8 sps:$4 sm:$0xff]   ;;  %v1440_v43 = vld [vmem:[%s1996_s1 + $0x74] ss:$8 sps:$4 sm:$0xff]   ;;  %v1385_v44 = vld [vmem:[%s1996_s1 + $0x1d0] ss:$8 sps:$4 sm:$0xff]  }
  0x35   :  { %723 = vmatprep.subr.bf16.mxu0 %v1356_v8  ;;  %679 = vmatpush1.bf16.msra.mxu1 %v1415_v26  ;;  %v1386_v45 = vld [vmem:[%s1996_s1 + $0x1e4] ss:$8 sps:$4 sm:$0xff]   ;;  %v1445_v46 = vld [vmem:[%s1996_s1 + $0x70] ss:$8 sps:$4 sm:$0xff]   ;;  %v1388_v48 = vld [vmem:[%s1996_s1 + $0x1e0] ss:$8 sps:$4 sm:$0xff]  }
  0x36   :  { %680 = vmatprep.subr.bf16.mxu1 %v1416_v27  ;;  %v1446_v47 = vld [vmem:[%s1996_s1 + $0x84] ss:$8 sps:$4 sm:$0xff]   ;;  %v1389_v49 = vld [vmem:[%s1996_s1 + $0x1f4] ss:$8 sps:$4 sm:$0xff]   ;;  %v1451_v50 = vld [vmem:[%s1996_s1 + $0x80] ss:$8 sps:$4 sm:$0xff]  }
  0x37   :  { %v1391_v51 = vld [vmem:[%s1996_s1 + $0x1f0] ss:$8 sps:$4 sm:$0xff]   ;;  %v1452_v52 = vld [vmem:[%s1996_s1 + $0x94] ss:$8 sps:$4 sm:$0xff]   ;;  %v1394_v54 = vld [vmem:[%s1996_s1 + $0x204] ss:$8 sps:$4 sm:$0xff]  }
  0x38   :  { %724 = vmatpush1.bf16.msra.mxu0 %v1358_v9  ;;  %v58_v53 = vld [vmem:[%s1995_s0 + $0x10] sm:$0xff]  ;;  %v1458_v56 = vld [vmem:[%s1996_s1 + $0xa4] ss:$8 sps:$4 sm:$0xff]   ;;  %v1392_v59 = vld [vmem:[%s1996_s1 + $0x200] ss:$8 sps:$4 sm:$0xff]   ;;  %vm1593_vm1 = vmmov 0  }
  0x39   :  { %725 = vmatprep.subr.bf16.mxu0 %v1359_v10  ;;  %681 = vmatpush1.bf16.msra.mxu1 %v1421_v30  ;;  %v1457_v55 = vld [vmem:[%s1996_s1 + $0x90] ss:$8 sps:$4 sm:$0xff]   ;;  %v65_v57 = vpack.c.bf16 %v58_v53, %v58_v53  ;;  %v61_v58 = vld [vmem:[%s1995_s0 + $0x28] sm:$0xff]  ;;  %v1397_v61 = vld [vmem:[%s1996_s1 + $0x214] ss:$8 sps:$4 sm:$0xff]   ;;  %s1594_s15 = smov [#allocation7]  }
  0x3a   :  { %682 = vmatprep.subr.bf16.mxu1 %v1422_v31  ;;  %v68_v60 = vpack.c.bf16 %v61_v58, %v61_v58  ;;  %v1463_v62 = vld [vmem:[%s1996_s1 + $0xa0] ss:$8 sps:$4 sm:$0xff]   ;;  %v1464_v63 = vld [vmem:[%s1996_s1 + $0xb4] ss:$8 sps:$4 sm:$0xff]   ;;  %v1395_v1 = vld [vmem:[%s1996_s1 + $0x210] ss:$8 sps:$4 sm:$0xff]  }
  0x3b   :  { %v57_v0 = vld [vmem:[%s1995_s0 + $0x8] sm:$0xff]  ;;  %v1469_v4 = vld [vmem:[%s1996_s1 + $0xb0] ss:$8 sps:$4 sm:$0xff]   ;;  %v1408_v7 = vld [vmem:[%s1996_s1 + $0x234] ss:$8 sps:$4 sm:$0xff]   ;;  %s1138_s16 = sshll.u32 %s1594_s15, 4  ;;  %s1139_s16 = int_to_ptr.vmem [resolvable:$true] %s1138_s16 }
  0x3c   :  { %726 = vmatpush1.bf16.msra.mxu0 %v1361_v11  ;;  %v64_v2 = vpack.c.bf16 %v57_v0, %v57_v0  ;;  %v1402_v3 = vld [vmem:[%s1996_s1 + $0x224] ss:$8 sps:$4 sm:$0xff]   ;;  %v1400_v6 = vld [vmem:[%s1996_s1 + $0x220] ss:$8 sps:$4 sm:$0xff]   ;;  %v1476_v9 = vld [vmem:[%s1996_s1 + $0xd4] ss:$8 sps:$4 sm:$0xff]   ;;  %p1564_p3 = scmp.lt.s32.totalorder %s1139_s16, %s1139_s16 }
  0x3d   :  { %727 = vmatprep.subr.bf16.mxu0 %v1362_v12  ;;  %683 = vmatpush1.bf16.msra.mxu1 %v1427_v34  ;;  %v1470_v5 = vld [vmem:[%s1996_s1 + $0xc4] ss:$8 sps:$4 sm:$0xff]   ;;  %v1475_v8 = vld [vmem:[%s1996_s1 + $0xc0] ss:$8 sps:$4 sm:$0xff]   ;;  %v1406_v10 = vld [vmem:[%s1996_s1 + $0x230] ss:$8 sps:$4 sm:$0xff]  }
  0x3e   :  { %684 = vmatprep.subr.bf16.mxu1 %v1428_v35  ;;  %706 = vmatprep.mubr.bf16.mxu1 %v64_v2  ;;  %v1414_v11 = vld [vmem:[%s1996_s1 + $0x244] ss:$8 sps:$4 sm:$0xff]   ;;  %v1412_v12 = vld [vmem:[%s1996_s1 + $0x240] ss:$8 sps:$4 sm:$0xff]   ;;  %v1481_v13 = vld [vmem:[%s1996_s1 + $0xd0] ss:$8 sps:$4 sm:$0xff]  }
  0x3f   :  { %v1482_v14 = vld [vmem:[%s1996_s1 + $0xe4] ss:$8 sps:$4 sm:$0xff]   ;;  %v1488_v17 = vld [vmem:[%s1996_s1 + $0xf4] ss:$8 sps:$4 sm:$0xff]   ;;  %v1490_v20 = vld [vmem:[%s1996_s1 + $0xf0] ss:$8 sps:$4 sm:$0xff]  }
  0x40   :  { %728 = vmatpush1.bf16.msra.mxu0 %v1364_v15  ;;  %v1420_v15 = vld [vmem:[%s1996_s1 + $0x254] ss:$8 sps:$4 sm:$0xff]   ;;  %v56_v21 = vld [vmem:[%s1995_s0] sm:$0xff]  ;;  %v1497_v35 = vld [vmem:[#allocation2 + $0x58] sm:$0xff]  }
  0x41   :  { %729 = vmatprep.subr.bf16.mxu0 %v1365_v16  ;;  %685 = vmatpush1.bf16.msra.mxu1 %v1433_v38  ;;  %v1487_v16 = vld [vmem:[%s1996_s1 + $0xe0] ss:$8 sps:$4 sm:$0xff]   ;;  %v1491_v22 = vld [vmem:[#allocation2 + $0x40] sm:$0xff]   ;;  %v1493_v27 = vld [vmem:[#allocation2 + $0x48] sm:$0xff]  }
  0x42   :  { %686 = vmatprep.subr.bf16.mxu1 %v1434_v39  ;;  %v1424_v23 = vld [vmem:[%s1996_s1 + $0x260] ss:$8 sps:$4 sm:$0xff]   ;;  %v1492_v26 = vld [vmem:[#allocation2] sm:$0xff]   ;;  %v1494_v30 = vld [vmem:[#allocation2 + $0x8] sm:$0xff]  }
  0x43   :  { %v1495_v31 = vld [vmem:[#allocation2 + $0x50] sm:$0xff]   ;;  %v1498_v38 = vld [vmem:[#allocation2 + $0x18] sm:$0xff]   ;;  %v1499_v39 = vld [vmem:[#allocation2 + $0x60] sm:$0xff]  }
  0x44   :  { %730 = vmatpush1.bf16.msra.mxu0 %v1367_v18  ;;  %v1418_v18 = vld [vmem:[%s1996_s1 + $0x250] ss:$8 sps:$4 sm:$0xff]   ;;  %v1496_v34 = vld [vmem:[#allocation2 + $0x10] sm:$0xff]   ;;  %v1506_v0 = vld [vmem:[#allocation2 + $0x38] sm:$0xff]  }
  0x45   :  { %731 = vmatprep.subr.bf16.mxu0 %v1368_v19  ;;  %687 = vmatpush1.bf16.msra.mxu1 %v1439_v42  ;;  %v1426_v19 = vld [vmem:[%s1996_s1 + $0x264] ss:$8 sps:$4 sm:$0xff]   ;;  %v1500_v42 = vld [vmem:[#allocation2 + $0x20] sm:$0xff]  }
  0x46   :  { %688 = vmatprep.subr.bf16.mxu1 %v1440_v43  ;;  %v1454_v43 = vld [vmem:[%s1996_s1 + $0x2b0] ss:$8 sps:$4 sm:$0xff]   ;;  %v1486_v53 = vld [vmem:[%s1996_s1 + $0x304] ss:$8 sps:$4 sm:$0xff]  }
  0x48   :  { %732 = vmatpush1.bf16.msra.mxu0 %v1370_v24  ;;  %v1432_v24 = vld [vmem:[%s1996_s1 + $0x274] ss:$8 sps:$4 sm:$0xff]  }
  0x49   :  { %733 = vmatprep.subr.bf16.mxu0 %v1371_v25  ;;  %689 = vmatpush1.bf16.msra.mxu1 %v1445_v46  ;;  %v63_v25 = vpack.c.bf16 %v56_v21, %v56_v21  ;;  %v1468_v46 = vld [vmem:[%s1996_s1 + $0x2d4] ss:$8 sps:$4 sm:$0xff]  }
  0x4a   :  { %690 = vmatprep.subr.bf16.mxu1 %v1446_v47  ;;  %v1466_v47 = vld [vmem:[%s1996_s1 + $0x2d0] ss:$8 sps:$4 sm:$0xff]  }
  0x4c   :  { %734 = vmatpush1.bf16.msra.mxu0 %v1373_v28  ;;  %v1430_v28 = vld [vmem:[%s1996_s1 + $0x270] ss:$8 sps:$4 sm:$0xff]  }
  0x4d   :  { %735 = vmatprep.subr.bf16.mxu0 %v1374_v29  ;;  %691 = vmatpush1.bf16.msra.mxu1 %v1451_v50  ;;  %v1438_v29 = vld [vmem:[%s1996_s1 + $0x284] ss:$8 sps:$4 sm:$0xff]   ;;  %v1480_v50 = vld [vmem:[%s1996_s1 + $0x2f4] ss:$8 sps:$4 sm:$0xff]  }
  0x4e   :  { %692 = vmatprep.subr.bf16.mxu1 %v1452_v52  ;;  %v60_v52 = vld [vmem:[%s1995_s0 + $0x20] sm:$0xff] }
  0x50   :  { %736 = vmatpush1.bf16.msra.mxu0 %v1376_v32  ;;  %v1436_v32 = vld [vmem:[%s1996_s1 + $0x280] ss:$8 sps:$4 sm:$0xff]  }
  0x51   :  { %737 = vmatprep.subr.bf16.mxu0 %v1377_v33  ;;  %693 = vmatpush1.bf16.msra.mxu1 %v1457_v55  ;;  %v1444_v33 = vld [vmem:[%s1996_s1 + $0x294] ss:$8 sps:$4 sm:$0xff]   ;;  %v1484_v55 = vld [vmem:[%s1996_s1 + $0x300] ss:$8 sps:$4 sm:$0xff]  }
  0x52   :  { %694 = vmatprep.subr.bf16.mxu1 %v1458_v56  ;;  %v1591_v56 = vmov 0  }
  0x54   :  { %738 = vmatpush1.bf16.msra.mxu0 %v1379_v36  ;;  %v1442_v36 = vld [vmem:[%s1996_s1 + $0x290] ss:$8 sps:$4 sm:$0xff]  }
  0x55   :  { %739 = vmatprep.subr.bf16.mxu0 %v1380_v37  ;;  %695 = vmatpush1.bf16.msra.mxu1 %v1463_v62  ;;  %v1450_v37 = vld [vmem:[%s1996_s1 + $0x2a4] ss:$8 sps:$4 sm:$0xff]  }
  0x56   :  { %696 = vmatprep.subr.bf16.mxu1 %v1464_v63  ;;  %v1504_v62 = vld [vmem:[#allocation2 + $0x30] sm:$0xff]   ;;  %v1505_v63 = vld [vmem:[#allocation2 + $0x78] sm:$0xff]  }
  0x58   :  { %740 = vmatpush1.bf16.msra.mxu0 %v1382_v40  ;;  %v1448_v40 = vld [vmem:[%s1996_s1 + $0x2a0] ss:$8 sps:$4 sm:$0xff]  }
  0x59   :  { %741 = vmatprep.subr.bf16.mxu0 %v1383_v41  ;;  %697 = vmatpush1.bf16.msra.mxu1 %v1469_v4  ;;  %v1456_v41 = vld [vmem:[%s1996_s1 + $0x2b4] ss:$8 sps:$4 sm:$0xff]  }
  0x5a   :  { %698 = vmatprep.subr.bf16.mxu1 %v1470_v5 }
  0x5c   :  { %742 = vmatpush1.bf16.msra.mxu0 %v1385_v44  ;;  %v1462_v44 = vld [vmem:[%s1996_s1 + $0x2c4] ss:$8 sps:$4 sm:$0xff]  }
  0x5d   :  { %743 = vmatprep.subr.bf16.mxu0 %v1386_v45  ;;  %699 = vmatpush1.bf16.msra.mxu1 %v1475_v8  ;;  %v1460_v45 = vld [vmem:[%s1996_s1 + $0x2c0] ss:$8 sps:$4 sm:$0xff]  }
  0x5e   :  { %700 = vmatprep.subr.bf16.mxu1 %v1476_v9  ;;  %v168_v9 = vld [vmem:[%s1997_s2] sm:$0x3] }
  0x60   :  { %744 = vmatpush1.bf16.msra.mxu0 %v1388_v48  ;;  %v1474_v48 = vld [vmem:[%s1996_s1 + $0x2e4] ss:$8 sps:$4 sm:$0xff]  }
  0x61   :  { %745 = vmatprep.subr.bf16.mxu0 %v1389_v49  ;;  %701 = vmatpush1.bf16.msra.mxu1 %v1481_v13  ;;  %v1472_v49 = vld [vmem:[%s1996_s1 + $0x2e0] ss:$8 sps:$4 sm:$0xff]  }
  0x62   :  { %702 = vmatprep.subr.bf16.mxu1 %v1482_v14 }
  0x64   :  { %746 = vmatpush1.bf16.msra.mxu0 %v1391_v51  ;;  %v1478_v51 = vld [vmem:[%s1996_s1 + $0x2f0] ss:$8 sps:$4 sm:$0xff]  }
  0x65   :  { %756 = vmatprep.subr.bf16.mxu0 %v1394_v54  ;;  %703 = vmatpush1.bf16.msra.mxu1 %v1487_v16  ;;  %v67_v54 = vpack.c.bf16 %v60_v52, %v60_v52 }
  0x66   :  { %704 = vmatprep.subr.bf16.mxu1 %v1488_v17 }
  0x67   :  { %748 = vmatmul.mubr.bf16.vlgmr.msra.gmra.mrb[0].mxu0 %v65_v57  ;;  %v62_v57 = vld [vmem:[%s1995_s0 + $0x30] sm:$0xff] }
  0x68   :  { %757 = vmatpush1.bf16.msra.mxu0 %v1392_v59  ;;  %788 = vmatprep.mubr.bf16.mxu0 %v68_v60  ;;  %v69_v58 = vpack.c.bf16 %v62_v57, %v62_v57  ;;  %v1501_v59 = vld [vmem:[#allocation2 + $0x68] sm:$0xff]  }
  0x69   :  { %758 = vmatprep.subr.bf16.mxu0 %v1397_v61  ;;  %705 = vmatpush1.bf16.msra.mxu1 %v1490_v20  ;;  %v1502_v60 = vld [vmem:[#allocation2 + $0x28] sm:$0xff]   ;;  %v1503_v61 = vld [vmem:[#allocation2 + $0x70] sm:$0xff]  }
  0x6a   :  { %1273 = vmatprep.subr.bf16.mxu1 %v1491_v22 }
  0x6c   :  { %759 = vmatpush1.bf16.msra.mxu0 %v1395_v1  ;;  %707 = vmatmul.mubr.bf16.vlgmr.msra.gmra.mrb[0].mxu1 %v63_v25  ;;  %v1592_v1 = vmov 0.0  }
  0x6d   :  { %760 = vmatprep.subr.bf16.mxu0 %v1402_v3  ;;  %1274 = vmatpush3.bf16.msra.mxu1 %v1492_v26  ;;  %v1508_v26 = vld [vmem:[#allocation5 + $0x8] sm:$0xff]  }
  0x6e   :  { %1275 = vmatprep.subr.bf16.mxu1 %v1493_v27  ;;  %v1509_v27 = vld [vmem:[#allocation5 + $0x10] sm:$0xff]  }
  0x70   :  { %761 = vmatpush1.bf16.msra.mxu0 %v1400_v6  ;;  %v170_v6 = vlaneseq }
  0x71   :  { %762 = vmatprep.subr.bf16.mxu0 %v1408_v7  ;;  %1276 = vmatpush3.bf16.msra.mxu1 %v1494_v30  ;;  %v1512_v30 = vld [vmem:[#allocation5 + $0x28] sm:$0xff]  }
  0x72   :  { %1277 = vmatprep.subr.bf16.mxu1 %v1495_v31  ;;  %v171_v7 = vshrl.u32 %v170_v6, 7  ;;  %v1513_v31 = vld [vmem:[#allocation5 + $0x30] sm:$0xff]  }
  0x74   :  { %763 = vmatpush1.bf16.msra.mxu0 %v1406_v10  ;;  %v172_v8 = vsub.s32 0, %v171_v7  ;;  %v176_v10 = vsub.s32 1, %v171_v7 }
  0x75   :  { %764 = vmatprep.subr.bf16.mxu0 %v1414_v11  ;;  %1278 = vmatpush3.bf16.msra.mxu1 %v1496_v34  ;;  %v1247_v34 = vld [vmem:[%s1999_s4] ss:$0 sm:$0xff]  ;;  %s1559_s4 = scalar_lea.vmem %s1139_s16, 64 }
  0x76   :  { %1279 = vmatprep.subr.bf16.mxu1 %v1497_v35  ;;  %v173_v11 = vrot.slane %v168_v9, %v172_v8  ;;  %p1560_p2 = scmp.ne.s32.totalorder %s1139_s16, %s1559_s4  ;;  %p1565_p4 = scmp.lt.s32.totalorder %s1559_s4, %s1559_s4 }
  0x78   :  { %765 = vmatpush1.bf16.msra.mxu0 %v1412_v12  ;;  %v177_v12 = vrot.slane %v168_v9, %v176_v10  ;;  %p1566_p5 = por %p1565_p4, %p1564_p3 }
  0x79   :  { %766 = vmatprep.subr.bf16.mxu0 %v1420_v15  ;;  %1280 = vmatpush3.bf16.msra.mxu1 %v1498_v38 }
  0x7a   :  { %1281 = vmatprep.subr.bf16.mxu1 %v1499_v39  ;;  %p1567_p6 = pnand %p1566_p5, %p1560_p2 }
  0x7c   :  { %767 = vmatpush1.bf16.msra.mxu0 %v1418_v18 }
  0x7d   :  { %768 = vmatprep.subr.bf16.mxu0 %v1426_v19  ;;  %1282 = vmatpush3.bf16.msra.mxu1 %v1500_v42  ;;  %v1264_v42 = vld [vmem:[%s2001_s6] ss:$0 sm:$0xff] }
  0x7e   :  { %1283 = vmatprep.subr.bf16.mxu1 %v1501_v59 }
  0x80   :  { %769 = vmatpush1.bf16.msra.mxu0 %v1424_v23 }
  0x81   :  { %770 = vmatprep.subr.bf16.mxu0 %v1432_v24  ;;  %1284 = vmatpush3.bf16.msra.mxu1 %v1502_v60  ;;  %v1507_v24 = vld [vmem:[#allocation5] sm:$0xff]  }
  0x82   :  { %1285 = vmatprep.subr.bf16.mxu1 %v1503_v61 }
  0x84   :  { %771 = vmatpush1.bf16.msra.mxu0 %v1430_v28  ;;  %v1510_v28 = vld [vmem:[#allocation5 + $0x18] sm:$0xff]  }
  0x85   :  { %772 = vmatprep.subr.bf16.mxu0 %v1438_v29  ;;  %1286 = vmatpush3.bf16.msra.mxu1 %v1504_v62  ;;  %v1511_v29 = vld [vmem:[#allocation5 + $0x20] sm:$0xff]  }
  0x86   :  { %1287 = vmatprep.subr.bf16.mxu1 %v1505_v63 }
  0x88   :  { %773 = vmatpush1.bf16.msra.mxu0 %v1436_v32  ;;  %v1514_v32 = vld [vmem:[#allocation5 + $0x38] sm:$0xff]  }
  0x89   :  { %774 = vmatprep.subr.bf16.mxu0 %v1444_v33  ;;  %1288 = vmatpush3.bf16.msra.mxu1 %v1506_v0 }
  0x8a   :  { %1304 = vmatprep.subr.bf16.mxu1 %v1592_v1 }
  0x8c   :  { %775 = vmatpush1.bf16.msra.mxu0 %v1442_v36 }
  0x8d   :  { %776 = vmatprep.subr.bf16.mxu0 %v1450_v37 }
  0x90   :  { %777 = vmatpush1.bf16.msra.mxu0 %v1448_v40 }
  0x91   :  { %778 = vmatprep.subr.bf16.mxu0 %v1456_v41 }
  0x94   :  { %779 = vmatpush1.bf16.msra.mxu0 %v1454_v43 }
  0x95   :  { %780 = vmatprep.subr.bf16.mxu0 %v1462_v44 }
  0x98   :  { %781 = vmatpush1.bf16.msra.mxu0 %v1460_v45 }
  0x99   :  { %782 = vmatprep.subr.bf16.mxu0 %v1468_v46 }
  0x9c   :  { %783 = vmatpush1.bf16.msra.mxu0 %v1466_v47 }
  0x9d   :  { %784 = vmatprep.subr.bf16.mxu0 %v1474_v48 }
  0xa0   :  { %785 = vmatpush1.bf16.msra.mxu0 %v1472_v49 }
  0xa1   :  { %786 = vmatprep.subr.bf16.mxu0 %v1480_v50 }
  0xa4   :  { %787 = vmatpush1.bf16.msra.mxu0 %v1478_v51 }
  0xa5   :  { %797 = vmatprep.subr.bf16.mxu0 %v1486_v53 }
  0xa7   :  { %789 = vmatmul.mubr.bf16.vlgmr.msra.gmra.mrb[0].mxu0 %v67_v54 }
  0xa8   :  { %798 = vmatpush1.bf16.msra.mxu0 %v1484_v55  ;;  %829 = vmatprep.mubr.bf16.mxu0 %v1591_v56 }
  0xb3   :  { %1246 = vmatmul.mubr.msk.bf16.vlgmr.msra.gmra.mrb[0].mxu0 %vm670_vm0, %v69_v58 }
 0x13f   :  { %v708_v2 = vpop.f32.mrb[0].mxu1 }
 0x140   :  { %v710_v3 = vpop.f32.mrb[1].mxu1  ;;  %v709_v13 = vadd.f32 %v708_v2, %v173_v11 }
 0x141   :  { %v712_v4 = vpop.f32.mrb[2].mxu1  ;;  %v711_v14 = vadd.f32 %v710_v3, %v177_v12 }
 0x142   :  { %v713_v5 = vpop.f32.mrb[3].mxu1 }
 0x186   :  { %v831_v15 = vpop.f32.mrb[0].mxu0 }
 0x187   :  { %v1325_v16 = vadd.f32 %v831_v15, %v709_v13  ;;  %v833_v17 = vpop.f32.mrb[1].mxu0 }
 0x188   :  { %v1327_v18 = vadd.f32 %v833_v17, %v711_v14  ;;  %v835_v19 = vpop.f32.mrb[2].mxu0 }
 0x189   :  { %v838_v20 = vmax.f32 %v1325_v16, 0.0  ;;  %v836_v21 = vpop.f32.mrb[3].mxu0 }
 0x18a   :  { %v839_v22 = vmax.f32 %v1327_v18, 0.0 }
 0x18b   :  { %v840_v25 = vpack.c.bf16 %v838_v20, %v838_v20 }
 0x18c   :  { %v841_v23 = vpack.c.bf16 %v839_v22, %v839_v22 }
 0x18e   :  { %1009 = vmatprep.mubr.bf16.mxu1 %v841_v23 }
 0x18f   :  { %1010 = vmatmul.mubr.bf16.vlgmr.msra.gmra.mrb[4].mxu1 %v840_v25 }
 0x190   :  { %1305 = vmatpush3.bf16.msra.mxu1 %v1507_v24  ;;  %1320 = vmatprep.mubr.msk.bf16.mxu1 %vm1593_vm1, %v1592_v1 }
 0x191   :  { %1306 = vmatprep.subr.bf16.mxu1 %v1592_v1 }
 0x194   :  { %1307 = vmatpush3.bf16.msra.mxu1 %v1508_v26 }
 0x195   :  { %1308 = vmatprep.subr.bf16.mxu1 %v1592_v1 }
 0x198   :  { %1309 = vmatpush3.bf16.msra.mxu1 %v1509_v27 }
 0x199   :  { %1310 = vmatprep.subr.bf16.mxu1 %v1592_v1 }
 0x19c   :  { %1311 = vmatpush3.bf16.msra.mxu1 %v1510_v28 }
 0x19d   :  { %1312 = vmatprep.subr.bf16.mxu1 %v1592_v1 }
 0x1a0   :  { %1313 = vmatpush3.bf16.msra.mxu1 %v1511_v29 }
 0x1a1   :  { %1314 = vmatprep.subr.bf16.mxu1 %v1592_v1 }
 0x1a4   :  { %1315 = vmatpush3.bf16.msra.mxu1 %v1512_v30 }
 0x1a5   :  { %1316 = vmatprep.subr.bf16.mxu1 %v1592_v1 }
 0x1a8   :  { %1317 = vmatpush3.bf16.msra.mxu1 %v1513_v31 }
 0x1a9   :  { %1318 = vmatprep.subr.bf16.mxu1 %v1592_v1 }
 0x1ac   :  { %1319 = vmatpush3.bf16.msra.mxu1 %v1514_v32 }
 0x262   :  { %v1289_v33 = vpop.f32.mrb[4].mxu1 }
 0x263   :  { %v1290_v35 = vpop.f32.mrb[5].mxu1 }
 0x264   :  { %v1291_v36 = vadd.f32 %v1290_v35, %v1289_v33  ;;  %v1292_v37 = vpop.f32.mrb[6].mxu1 }
 0x265   :  { %v1293_v38 = vpop.f32.mrb[7].mxu1 }
 0x266   :  { %v1012_v39 = vadd.f32 %v1291_v36, %v1247_v34 }
 0x268   :  { %v1017_v40 = vmax.f32 %v1012_v39, 0.0 }
 0x26a   :  { %v1018_v41 = vpack.c.bf16 %v1017_v40, %v1017_v40 }
 0x26c   :  { %1321 = vmatmul.mubr.bf16.vlgmr.msra.gmra.mrb[8].mxu1 %v1018_v41 }
 0x33f   :  { %v1124_v43 = vpop.f32.mrb[8].mxu1 }
 0x340   :  { %v1125_v44 = vadd.f32 %v1264_v42, %v1124_v43  ;;  %v1322_v45 = vpop.f32.mrb[9].mxu1 }
 0x341   :  { %v1127_v46 = vpop.f32.mrb[10].mxu1 }
 0x342   :  { %v1130_v47 = vpack.c.bf16 %v1125_v44, %v1125_v44  ;;  %v1323_v48 = vpop.f32.mrb[11].mxu1 }
 0x344   :  { %1131 = vst [vmem:[#allocation7] sm:$0xf] %v1130_v47 }
 0x345   :  { %1570 = shalt.err (!%p1567_p6)
}
 0x346   :  { %s1571_s6 = scalar_lea.hbm %s2002_s7, 64 }
 0x347   :  { %p1572_p7 = scmp.ne.s32.totalorder %s2002_s7, %s1571_s6  ;;  %p1575_p8 = scmp.lt.u32.totalorder %s1571_s6, %s2002_s7 }
 0x349   :  { %p1577_p9 = pnand %p1575_p8, %p1572_p7 }
 0x34b   :  { %1580 = shalt.err (!%p1577_p9)
}
 0x34c   :  { %1141 = dma.vmem_to_hbm [thread:$0]  %s1139_s16, 64, %s2002_s7, [#allocation4]  }
 0x34d   :  { %1585 = dma.done.wait [#allocation4], 64  }
 0x34e   :  { %1586 = vsyncadd [#allocation4], 4294967232 }
 0x34f   :  { %1145 = vsyncpa [#allocation3], 1 }
 0x350   :  { %1146 = vsyncpa [#allocation6], 1 }
 0x351   :  { %1147 = vsyncpa [#allocation4], 1 }

</bundles_post_ra>
